<compile_context>
chip_gen: v5e
topology: v5e:2x2
jax: 0.10.0
libtpu: 0.0.40
codegen_flags: <defaults>
</compile_context>

<pallas_src>
import functools
import math

import jax
import jax.numpy as jnp
from jax.experimental import pallas as pl
from jax.experimental.pallas import tpu as pltpu


def _self_gating_kernel(x_ref, w_ref, b_ref, o_ref, *, tn, full_width):
    # x_ref: (tm, Dp)  full-width row tile of x (native dtype)
    # w_ref: (tn, Dp)  row slab of the Linear weight, PyTorch (out, in) layout
    # b_ref: (1, tn)   bias slab
    # o_ref: (tm, tn)  output tile
    x = x_ref[...]
    # x @ W.T : contract the last dim of both operands on the MXU (f32 acc).
    logits = jax.lax.dot_general(
        x, w_ref[...],
        dimension_numbers=(((1,), (1,)), ((), ())),
        preferred_element_type=jnp.float32)
    logits = logits + b_ref[...].astype(jnp.float32)
    gate = jax.nn.sigmoid(logits)                         # f32 VPU/EUP math
    if full_width:
        xg = x
    else:
        col0 = pl.multiple_of(pl.program_id(0) * tn, 128)
        xg = x_ref[:, pl.ds(col0, tn)]
    if xg.dtype == jnp.bfloat16:
        # bf16 VALU epilogue on v6e/v7x; accumulation already done in f32.
        o_ref[...] = (xg * gate.astype(jnp.bfloat16)).astype(o_ref.dtype)
    else:
        o_ref[...] = (xg.astype(jnp.float32) * gate).astype(o_ref.dtype)


def _round_up(x, m):
    return (x + m - 1) // m * m


def _vmem_budget_bytes():
    """Usable VMEM budget for this generation (leaves compiler headroom)."""
    cap = 64 << 20                       # conservative default (v7x per-TC)
    try:
        info = pltpu.get_tpu_info()
        cap = int(getattr(info, "vmem_capacity_bytes", cap))
    except Exception:
        pass
    # ~48 MiB on v7x (64 MiB physical), ~96 MiB on v5e/v6e (128 MiB physical).
    return max((cap * 3) // 4, 32 << 20)


def _choose_plan(M, D, x_dtype, w_dtype, tm_pref, budget):
    """Pick (full_weight?, tm, tn, Dp) such that double-buffered tiles fit."""
    bpe_x = jnp.dtype(x_dtype).itemsize
    bpe_w = jnp.dtype(w_dtype).itemsize
    sub = max(8, 32 // bpe_x)                  # sublane packing: 8 / 16 / 32
    slack = 2 << 20

    def need(tm, dp, tn):
        # Pallas double-buffers every BlockSpec'd operand by default.
        return 2 * (tm * dp * bpe_x            # x row tile
                    + tn * dp * bpe_w          # weight slab
                    + tn * bpe_w               # bias slab
                    + tm * tn * bpe_x) + slack # output tile

    tm0 = min(_round_up(tm_pref, sub), _round_up(M, sub))

    # ---- plan A: whole weight resident, no D padding, single column tile ----
    tm = tm0
    tm_min = min(tm0, max(sub, 128))
    while True:
        n = need(tm, D, D)
        if n <= budget:
            return dict(full=True, tm=tm, tn=D, dp=D, need=n)
        if tm <= tm_min:
            break
        tm = max(tm_min, tm // 2)

    # ---- plan B: column-tiled, weight-stationary (row axis innermost) ----
    dp = _round_up(D, 128)
    tm = tm0
    while True:
        # Prefer 256-wide multiples (v6e/v7x MXU is 2x256^2), then 128-wide.
        cands = [t for t in range(min(2048, dp), 0, -256)
                 if t % 256 == 0 and dp % t == 0]
        cands += [t for t in range(min(2048, dp), 0, -128) if dp % t == 0]
        for tn in cands:
            n = need(tm, dp, tn)
            if n <= budget:
                return dict(full=False, tm=tm, tn=tn, dp=dp, need=n)
        if tm <= sub:
            break
        tm = max(sub, tm // 2)

    # Last resort (absurdly large d_model): smallest tiles.
    # TODO(synk): also tile the contraction (d_in) dimension for huge D.
    tn = 128 if dp % 128 == 0 else dp
    return dict(full=False, tm=sub, tn=tn, dp=dp, need=need(sub, dp, tn))


def self_gating(x, weight, bias, *, tm=512):
    """SelfGating forward: x * sigmoid(x @ W.T + b).

    x: (..., D); weight: (D, D) in PyTorch Linear (out, in) layout; bias: (D,).
    """
    orig_shape = x.shape
    D = orig_shape[-1]
    M = math.prod(orig_shape[:-1])
    x2 = x.reshape(M, D)

    budget = _vmem_budget_bytes()
    plan = _choose_plan(M, D, x2.dtype, weight.dtype, tm, budget)
    tm_eff, tn_eff, Dp, full = plan["tm"], plan["tn"], plan["dp"], plan["full"]

    if Dp != D:  # only in the column-tiled path for non-128-aligned d_model
        x2 = jnp.pad(x2, ((0, 0), (0, Dp - D)))
        weight = jnp.pad(weight, ((0, Dp - D), (0, Dp - D)))
        bias = jnp.pad(bias, ((0, Dp - D),))
    b2 = bias.reshape(1, Dp)

    # Weight-stationary grid: column tiles outer, row tiles inner (ragged M).
    grid = (Dp // tn_eff, pl.cdiv(M, tm_eff))

    kernel = functools.partial(_self_gating_kernel, tn=tn_eff, full_width=full)
    vmem_limit = int(min(max(plan["need"] + (4 << 20), 32 << 20), budget))

    out = pl.pallas_call(
        kernel,
        out_shape=jax.ShapeDtypeStruct((M, Dp), x.dtype),
        grid_spec=pltpu.PrefetchScalarGridSpec(
            num_scalar_prefetch=0,
            grid=grid,
            in_specs=[
                pl.BlockSpec((tm_eff, Dp), lambda j, i: (i, 0)),   # x row tile
                pl.BlockSpec((tn_eff, Dp), lambda j, i: (j, 0)),   # weight slab
                pl.BlockSpec((1, tn_eff), lambda j, i: (0, j)),    # bias slab
            ],
            out_specs=pl.BlockSpec((tm_eff, tn_eff), lambda j, i: (i, j)),
        ),
        compiler_params=pltpu.CompilerParams(
            dimension_semantics=("parallel", "parallel"),
            vmem_limit_bytes=vmem_limit,
        ),
    )(x2, weight, b2)

    if Dp != D:
        out = out[:, :D]
    return out.reshape(orig_shape)


def self_gating_ref(x, weight, bias):
    logits = jnp.einsum("...d,ed->...e", x, weight) + bias
    return x * jax.nn.sigmoid(logits)


if __name__ == "__main__":
    key = jax.random.PRNGKey(0)
    B, S, D = 2, 8, 32
    kx, kw, kb = jax.random.split(key, 3)

    x = jax.random.normal(kx, (B, S, D), dtype=jnp.float32)
    # deterministic init mimicking PyTorch Linear default (uniform +-1/sqrt(D))
    bound = 1.0 / (D ** 0.5)
    weight = jax.random.uniform(kw, (D, D), minval=-bound, maxval=bound,
                                dtype=jnp.float32)
    bias = jax.random.uniform(kb, (D,), minval=-bound, maxval=bound,
                              dtype=jnp.float32)

    out = jax.block_until_ready(self_gating(x, weight, bias))

    ref = self_gating_ref(x, weight, bias)
    assert out.shape == ref.shape, "shape mismatch vs reference"
    assert jnp.allclose(out, ref, atol=1e-5, rtol=1e-5), "mismatch vs reference"

    print("KERNEL_OK")
</pallas_src>

<mosaic_0001>
module attributes {stable_mosaic.version = 11 : i64} {
  func.func @_self_gating_kernel(%arg0: i32, %arg1: i32, %arg2: memref<16x32xf32, #tpu.memory_space<vmem>>, %arg3: memref<32x32xf32, #tpu.memory_space<vmem>>, %arg4: memref<1x32xf32, #tpu.memory_space<vmem>>, %arg5: memref<16x32xf32, #tpu.memory_space<vmem>>) attributes {dimension_semantics = [#tpu.dimension_semantics<parallel>, #tpu.dimension_semantics<parallel>], iteration_bounds = array<i64: 1, 1>, scalar_prefetch = 0 : i64, scratch_operands = 0 : i64, tpu.core_type = #tpu.core_type<tc>, window_params = [{transform_indices = @transform_0, window_bounds = array<i64: 16, 32>}, {transform_indices = @transform_1, window_bounds = array<i64: 32, 32>}, {transform_indices = @transform_2, window_bounds = array<i64: 1, 32>}, {transform_indices = @transform_3, window_bounds = array<i64: 16, 32>}]} {
    %c0 = arith.constant 0 : index
    %c0_0 = arith.constant 0 : index
    %0 = vector.load %arg2[%c0, %c0_0] : memref<16x32xf32, #tpu.memory_space<vmem>>, vector<16x32xf32>
    %c0_1 = arith.constant 0 : index
    %c0_2 = arith.constant 0 : index
    %1 = vector.load %arg3[%c0_1, %c0_2] : memref<32x32xf32, #tpu.memory_space<vmem>>, vector<32x32xf32>
    %cst = arith.constant dense<0.000000e+00> : vector<16x32xf32>
    %2 = tpu.matmul %0, %1, %cst {dimension_numbers = #tpu.dot_dimension_numbers<[1], [1], [0], [0], [0, 0, 1, 0], [], []>} : vector<16x32xf32>, vector<32x32xf32>, vector<16x32xf32> -> vector<16x32xf32>
    %c0_3 = arith.constant 0 : index
    %c0_4 = arith.constant 0 : index
    %3 = vector.load %arg4[%c0_3, %c0_4] : memref<1x32xf32, #tpu.memory_space<vmem>>, vector<1x32xf32>
    %4 = vector.broadcast %3 : vector<1x32xf32> to vector<16x32xf32>
    %5 = arith.addf %2, %4 : vector<16x32xf32>
    %6 = arith.negf %5 : vector<16x32xf32>
    %7 = math.exp %6 : vector<16x32xf32>
    %cst_5 = arith.constant 1.000000e+00 : f32
    %8 = vector.broadcast %cst_5 : f32 to vector<16x32xf32>
    %9 = arith.addf %8, %7 : vector<16x32xf32>
    %10 = arith.divf %8, %9 : vector<16x32xf32>
    %11 = arith.mulf %0, %10 : vector<16x32xf32>
    %c0_6 = arith.constant 0 : index
    %c0_7 = arith.constant 0 : index
    %12 = vector.load %arg5[%c0_6, %c0_7] : memref<16x32xf32, #tpu.memory_space<vmem>>, vector<16x32xf32>
    tpu.vector_store %arg5[%c0_6, %c0_7], %11 {strides = array<i32>} : memref<16x32xf32, #tpu.memory_space<vmem>>, vector<16x32xf32>,
    return
  }
  func.func @transform_0(%arg0: i32, %arg1: i32) -> (i32, i32) {
    %c0_i32 = arith.constant 0 : i32
    %c0_i32_0 = arith.constant 0 : i32
    return %arg1, %c0_i32 : i32, i32
  }
  func.func @transform_1(%arg0: i32, %arg1: i32) -> (i32, i32) {
    %c0_i32 = arith.constant 0 : i32
    %c0_i32_0 = arith.constant 0 : i32
    return %arg0, %c0_i32 : i32, i32
  }
  func.func @transform_2(%arg0: i32, %arg1: i32) -> (i32, i32) {
    %c0_i32 = arith.constant 0 : i32
    %c0_i32_0 = arith.constant 0 : i32
    return %c0_i32, %arg0 : i32, i32
  }
  func.func @transform_3(%arg0: i32, %arg1: i32) -> (i32, i32) {
    %c0_i32 = arith.constant 0 : i32
    return %arg1, %arg0 : i32, i32
  }
}

</mosaic_0001>

<bundles_post_ra>
// kernel: tpu_custom_call.1
= control target key start
LH: loop header
LB: loop body
LE: loop exit
PB: predicated region body
PF: predicated region fallthrough
CT: control target
= control target key end

     0   :  { %8 = vsyncpa [#allocation3], 0  ;;  %s323_s0 = inlined_call_operand.hbm [shape: f32[16,32], index: 0, kind: input, shape index: {}]   ;;  %s324_s1 = inlined_call_operand.hbm [shape: f32[32,32], index: 1, kind: input, shape index: {}]   ;;  %s325_s2 = inlined_call_operand.vmem [shape: f32[1,32], index: 2, kind: input, shape index: {}]   ;;  %s326_s3 = inlined_call_operand.hbm [shape: f32[16,32], index: 3, kind: output, shape index: {}]  }
   0x1   :  { %9 = vsyncpa [#allocation6], 0 }
   0x2   :  { %10 = vsyncpa [#allocation4], 0  ;;  %s15_s14 = sshll.u32 %s323_s0, 4  ;;  %s265_s15 = smov [#allocation2]   ;;  %s16_s14 = int_to_ptr.hbm [resolvable:$true] %s15_s14 }
   0x3   :  { %s17_s16 = sshll.u32 %s265_s15, 4  ;;  %s28_s19 = sshll.u32 %s324_s1, 4  ;;  %s18_s16 = int_to_ptr.vmem [resolvable:$true] %s17_s16  ;;  %s29_s19 = int_to_ptr.hbm [resolvable:$true] %s28_s19 }
   0x4   :  { %s266_s20 = smov 128   ;;  %s267_s21 = smov 8  }
   0x5   :  { %23 = dma.hbm_to_vmem [thread:$0]  %s16_s14, 256, %s18_s16, [#allocation3], %s266_s20, %s266_s20, %s267_s21  }
   0x6   :  { %s268_s22 = smov [#allocation5]  }
   0x7   :  { %s30_s23 = sshll.u32 %s268_s22, 4  ;;  %s31_s23 = int_to_ptr.vmem [resolvable:$true] %s30_s23 }
   0x8   :  { %36 = dma.hbm_to_vmem [thread:$0]  %s29_s19, 512, %s31_s23, [#allocation6], %s266_s20, %s266_s20, %s267_s21  }
   0x9   :  { %259 = dma.done.wait [#allocation3], 256  }
   0xa   :  { %260 = vsyncadd [#allocation3], 4294967040 }
   0xb   :  { %261 = dma.done.wait [#allocation6], 512  }
   0xc   :  { %262 = vsyncadd [#allocation6], 4294966784  ;;  %vm57_vm0 = vcmask 261120   ;;  %v52_v0 = vld [vmem:[#allocation5 + $0x18] sm:$0xff]  ;;  %v51_v1 = vld [vmem:[#allocation5 + $0x10] sm:$0xff]  ;;  %s147_s27 = sshll.u32 %s326_s3, 4  ;;  %s148_s27 = int_to_ptr.hbm [resolvable:$true] %s147_s27 }
   0xd   :  { %161 = vmatpush.xpose.msk.msra.mxu0 %vm57_vm0, %v52_v0  ;;  %169 = vmatpush.xpose.msk.msra.mxu1 %vm57_vm0, %v52_v0  ;;  %v50_v2 = vld [vmem:[#allocation5 + $0x8] sm:$0xff]  ;;  %v49_v3 = vld [vmem:[#allocation5] sm:$0xff]  ;;  %v47_v4 = vld [vmem:[#allocation2] sm:$0xff] }
   0xe   :  { %v48_v5 = vld [vmem:[#allocation2 + $0x8] sm:$0xff]  ;;  %v178_v6 = vld [vmem:[%s325_s2] ss:$0 sm:$0xff]  ;;  %s269_s2 = smov [#allocation7]  }
   0xf   :  { %s145_s24 = sshll.u32 %s269_s2, 4  ;;  %s146_s24 = int_to_ptr.vmem [resolvable:$true] %s145_s24 }
  0x11   :  { %162 = vmatpush.xpose.msk.msra.mxu0 %vm57_vm0, %v51_v1  ;;  %170 = vmatpush.xpose.msk.msra.mxu1 %vm57_vm0, %v51_v1 }
  0x15   :  { %163 = vmatpush.xpose.msk.msra.mxu0 %vm57_vm0, %v50_v2  ;;  %171 = vmatpush.xpose.msk.msra.mxu1 %vm57_vm0, %v50_v2 }
  0x19   :  { %164 = vmatpush.xpose.msk.msra.mxu0 %vm57_vm0, %v49_v3  ;;  %172 = vmatpush.xpose.msk.msra.mxu1 %vm57_vm0, %v49_v3 }
  0x1c   :  { %165 = vmatmul.msk.f32.vlgmr.msra.gmra.mxu0 %vm57_vm0, %v47_v4  ;;  %166 = vmatmul.msk.f32.vlgmr.msra.gmra.mxu1 %vm57_vm0, %v48_v5 }
  0x99   :  { %v93_v7 = vpop.f32.mrf.mxu0  ;;  %v96_v8 = vpop.f32.mrf.mxu1 }
  0x9a   :  { %v94_v9 = vadd.f32 %v178_v6, %v93_v7  ;;  %v97_v10 = vadd.f32 %v178_v6, %v96_v8 }
  0x9c   :  { %v167_v11 = vmul.f32 -1.442695, %v94_v9  ;;  %v168_v12 = vmul.f32 -1.442695, %v97_v10 }
  0x9e   :  { %179 = vpow2.f32 %v167_v11 }
  0x9f   :  { %181 = vpow2.f32 %v168_v12 }
  0xa4   :  { %v180_v13 = vpop.eup %179 }
  0xa5   :  { %v182_v14 = vpop.eup %181  ;;  %v105_v15 = vadd.f32 1.0, %v180_v13 }
  0xa6   :  { %v106_v16 = vadd.f32 1.0, %v182_v14 }
  0xa7   :  { %183 = vrcp.f32 %v105_v15  ;;  %v118_v22 = vand.u32 2147483648, %v105_v15  ;;  %v116_v26 = vand.u32 2147483647, %v105_v15  ;;  %vm112_vm3 = vweird.f32 %v105_v15 }
  0xa8   :  { %185 = vrcp.f32 %v106_v16  ;;  %v133_v25 = vand.u32 2147483648, %v106_v16  ;;  %v131_v28 = vand.u32 2147483647, %v106_v16  ;;  %vm127_vm4 = vweird.f32 %v106_v16 }
  0xa9   :  { %v119_v30 = vor.u32 1.1754944e-38, %v118_v22  ;;  %vm117_vm6 = vcmp.eq.f32.partialorder %v116_v26, 8.507059e+37 }
  0xaa   :  { %v134_v33 = vor.u32 1.1754944e-38, %v133_v25  ;;  %vm132_vm8 = vcmp.eq.f32.partialorder %v131_v28, 8.507059e+37 }
  0xad   :  { %v184_v17 = vpop.eup %183 }
  0xae   :  { %v186_v18 = vpop.eup %185  ;;  %v108_v19 = vmul.f32 %v184_v17, %v105_v15  ;;  %vm113_vm1 = vweird.f32 %v184_v17 }
  0xaf   :  { %v123_v20 = vmul.f32 %v186_v18, %v106_v16  ;;  %vm128_vm2 = vweird.f32 %v186_v18  ;;  %vm114_vm5 = vmor %vm112_vm3, %vm113_vm1 }
  0xb0   :  { %v109_v21 = vsub.f32 1.0, %v108_v19  ;;  %vm129_vm7 = vmor %vm127_vm4, %vm128_vm2 }
  0xb1   :  { %v124_v23 = vsub.f32 1.0, %v123_v20 }
  0xb2   :  { %v110_v24 = vmul.f32 %v184_v17, %v109_v21 }
  0xb3   :  { %v125_v27 = vmul.f32 %v186_v18, %v124_v23 }
  0xb4   :  { %v111_v29 = vadd.f32 %v184_v17, %v110_v24 }
  0xb5   :  { %v126_v31 = vadd.f32 %v186_v18, %v125_v27 }
  0xb6   :  { %v115_v32 = vsel %vm114_vm5, %v184_v17, %v111_v29 }
  0xb7   :  { %v120_v34 = vsel %vm117_vm6, %v119_v30, %v115_v32  ;;  %v130_v35 = vsel %vm129_vm7, %v186_v18, %v126_v31 }
  0xb8   :  { %v135_v36 = vsel %vm132_vm8, %v134_v33, %v130_v35  ;;  %v137_v37 = vmul.f32 %v120_v34, %v47_v4 }
  0xb9   :  { %v138_v38 = vmul.f32 %v135_v36, %v48_v5 }
  0xba   :  { %139 = vst.msk [vmem:[#allocation7] sm:$0xff] %vm57_vm0, %v137_v37 }
  0xbb   :  { %140 = vst.msk [vmem:[#allocation7 + $0x8] sm:$0xff] %vm57_vm0, %v138_v38 }
  0xbc   :  { %153 = dma.vmem_to_hbm [thread:$0]  %s146_s24, 256, %s148_s27, [#allocation4], %s266_s20, %s266_s20, %s267_s21  }
  0xbd   :  { %263 = dma.done.wait [#allocation4], 256  }
  0xbe   :  { %264 = vsyncadd [#allocation4], 4294967040 }
  0xbf   :  { %158 = vsyncpa [#allocation3], 1 }
  0xc0   :  { %159 = vsyncpa [#allocation6], 1 }
  0xc1   :  { %160 = vsyncpa [#allocation4], 1 }

</bundles_post_ra>
